<compile_context>
chip_gen: v6e
topology: v6e:2x2x1
jax: 0.10.0
libtpu: 0.0.40
codegen_flags: <defaults>
</compile_context>

<pallas_src>
import numpy as np
import jax
import jax.numpy as jnp
from jax.experimental import pallas as pl
from jax.experimental.pallas import tpu as pltpu


NUM_ANCHORS = 3
MATCHING_OVERLAP_THRESHOLD = 0.5
LOSS_WEIGHT = 1.0


def _round_up(x, m):
    return ((x + m - 1) // m) * m


def _pick_strips(H, W):
    """Most row-strips S such that H % S == 0 and each strip's flattened
    output (H//S)*W stays a multiple of 128 (lane-dense unmasked stores)."""
    for S in range(H, 0, -1):
        if H % S == 0 and ((H // S) * W) % 128 == 0:
            return S
    return 1


# ----------------------------------------------------------------------------
# Pallas kernel 1: fused RPN head, one (image, row-strip) per grid step.
#   im2col  : (TH*W, 9C) slab built in VMEM from 9 shifted bf16 slices
#   conv3x3 : single (TH*W, 9C) x (9C, C) bf16 matmul, f32 accumulation
#   t       : relu(conv + b_conv)                    (f32 VPU path)
#   heads^T : w_heads(A_pad, C) . t(TH*W, C)^T  ->  (A_pad, TH*W)
# Output is transposed so TH*W (multiple of 128) sits on the lane axis.
# ----------------------------------------------------------------------------
def _rpn_head_kernel(x_ref, wconv_ref, bconv_ref, wheads_ref, bheads_ref,
                     out_ref):
    W = x_ref.shape[2] - 2
    C = x_ref.shape[3]
    TH = out_ref.shape[2] // W

    s = pl.program_id(1)
    row0 = pl.multiple_of(s * TH, TH)
    # Strip + 1-row halo of the padded image (leading-dim dynamic slice).
    x = x_ref[0, pl.ds(row0, TH + 2), :, :]            # (TH+2, W+2, C) bf16

    # im2col slab: concat the nine shifted taps along channels, reshape once.
    taps = []
    for dy in range(3):                                 # static, unrolled
        for dx in range(3):
            taps.append(x[dy:dy + TH, dx:dx + W, :])    # (TH, W, C)
    slab = jnp.concatenate(taps, axis=-1).reshape(TH * W, 9 * C)   # bf16

    conv = jnp.dot(slab, wconv_ref[...],
                   preferred_element_type=jnp.float32)  # (TH*W, C) f32
    t = jnp.maximum(conv + bconv_ref[...], 0.0)         # f32 bias + ReLU

    # Fused cls+reg 1x1 heads; contract both operands on their last (C) dim so
    # no explicit transpose is emitted; result (A_pad, TH*W) is lane-dense.
    heads = jax.lax.dot_general(
        wheads_ref[...], t.astype(jnp.bfloat16),
        (((1,), (1,)), ((), ())),
        preferred_element_type=jnp.float32)
    out_ref[0] = heads + bheads_ref[...]


def rpn_head_pallas(feat_nchw, w_conv, b_conv, w_heads, b_heads):
    """feat_nchw: (N, C, H, W) f32.  Returns (N, A_pad, H*W) f32 where rows
    [0:NUM_ANCHORS] are objectness logits and rows [NUM_ANCHORS:5*NUM_ANCHORS]
    are box-regression channels (remaining rows are zero padding)."""
    N, C, H, W = feat_nchw.shape
    A_pad = w_heads.shape[0]
    S = _pick_strips(H, W)
    TH = H // S

    # One-time layout prep in bf16 (halves the bytes the kernel re-reads).
    # TODO(synk): at production feature sizes fold the transpose/pad into the
    # Pallas pipeline with haloed row-strip input blocks (v7x 64 MiB VMEM).
    x = jnp.transpose(feat_nchw.astype(jnp.bfloat16), (0, 2, 3, 1))
    x = jnp.pad(x, ((0, 0), (1, 1), (1, 1), (0, 0)))    # (N, H+2, W+2, C)

    return pl.pallas_call(
        _rpn_head_kernel,
        grid=(N, S),
        in_specs=[
            # Per-image block; index map is constant in s, so the strip loop
            # revisits the resident buffer instead of re-DMA'ing it.
            pl.BlockSpec((1, H + 2, W + 2, C), lambda n, s: (n, 0, 0, 0)),
            pl.BlockSpec((9 * C, C), lambda n, s: (0, 0)),   # weights resident
            pl.BlockSpec((1, C), lambda n, s: (0, 0)),
            pl.BlockSpec((A_pad, C), lambda n, s: (0, 0)),
            pl.BlockSpec((A_pad, 1), lambda n, s: (0, 0)),
        ],
        out_specs=pl.BlockSpec((1, A_pad, TH * W), lambda n, s: (n, 0, s)),
        out_shape=jax.ShapeDtypeStruct((N, A_pad, H * W), jnp.float32),
        compiler_params=pltpu.CompilerParams(
            dimension_semantics=("parallel", "parallel")),
    )(x, w_conv, b_conv, w_heads, b_heads)


# ----------------------------------------------------------------------------
# Pallas kernel 2: batched pairwise mask IoU (all images in one launch).
# Masks are bf16 {0,1}; a ones row rides in the padding of BOTH operands so a
# single dot_general yields inter, target areas and proposal areas exactly
# (f32 accumulation).  Exact divide keeps 0.5-threshold decisions bit-stable.
# ----------------------------------------------------------------------------
def _mask_iou_kernel(t_ref, p_ref, iou_ref):
    t = t_ref[0]                                        # (Tpad, HW) bf16
    p = p_ref[0]                                        # (Ppad, HW) bf16
    inter = jax.lax.dot_general(t, p, (((1,), (1,)), ((), ())),
                                preferred_element_type=jnp.float32)
    Tpad, Ppad = inter.shape
    t_area = inter[:, Ppad - 1:Ppad]                    # t . ones  -> (Tpad, 1)
    p_area = inter[Tpad - 1:Tpad, :]                    # ones . p  -> (1, Ppad)
    union = jnp.maximum(t_area + p_area - inter, 1.0)
    iou_ref[0] = inter / union                          # exact divide (tiny)


def mask_iou_pallas(target_masks, proposal_masks):
    """target_masks (N, Tpad, HW) bf16, proposal_masks (N, Ppad, HW) bf16
    (last row of each = ones) -> (N, Tpad, Ppad) f32 IoU."""
    N, Tpad, HW = target_masks.shape
    _, Ppad, _ = proposal_masks.shape
    return pl.pallas_call(
        _mask_iou_kernel,
        grid=(N,),
        in_specs=[
            pl.BlockSpec((1, Tpad, HW), lambda n: (n, 0, 0)),
            pl.BlockSpec((1, Ppad, HW), lambda n: (n, 0, 0)),
        ],
        out_specs=pl.BlockSpec((1, Tpad, Ppad), lambda n: (n, 0, 0)),
        out_shape=jax.ShapeDtypeStruct((N, Tpad, Ppad), jnp.float32),
        compiler_params=pltpu.CompilerParams(
            dimension_semantics=("parallel",)),
    )(target_masks, proposal_masks)


# ----------------------------------------------------------------------------
# Deterministic parameter init (shapes implied by rpn.build_rpn(output_channel))
# ----------------------------------------------------------------------------
def init_rpn_params(key, C, num_anchors):
    k = jax.random.split(key, 3)
    # PyTorch conv weight layout (C_out, C_in, kH, kW)
    w_conv_t = jax.random.normal(k[0], (C, C, 3, 3), jnp.float32) * 0.05
    # -> (kH, kW, C_in, C_out) -> (9*C_in, C_out); row = (dy*3+dx)*C + cin
    w_conv = jnp.transpose(w_conv_t, (2, 3, 1, 0)).reshape(9 * C, C)
    b_conv = jnp.zeros((1, C), jnp.float32)
    w_cls = jax.random.normal(k[1], (C, num_anchors), jnp.float32) * 0.05
    b_cls = jnp.zeros((num_anchors,), jnp.float32)
    w_reg = jax.random.normal(k[2], (C, 4 * num_anchors), jnp.float32) * 0.05
    b_reg = jnp.zeros((4 * num_anchors,), jnp.float32)

    # Fused, output-transposed heads: rows = [cls(3), reg(12), pad], padded to
    # a multiple of 8 for the sublane axis of the (A_pad, TH*W) output.
    a_tot = num_anchors + 4 * num_anchors
    a_pad = _round_up(a_tot, 8)
    w_heads = jnp.zeros((a_pad, C), jnp.float32)
    w_heads = w_heads.at[:num_anchors].set(w_cls.T)
    w_heads = w_heads.at[num_anchors:a_tot].set(w_reg.T)
    b_heads = jnp.zeros((a_pad, 1), jnp.float32)
    b_heads = b_heads.at[:num_anchors, 0].set(b_cls)
    b_heads = b_heads.at[num_anchors:a_tot, 0].set(b_reg)

    # Pad rows MUST stay exactly zero: the wrapper slices rows [0:a_tot] for
    # losses/top_k and the padding never leaks.  Assert so a future non-zero
    # bias pad is caught immediately.
    assert np.all(np.asarray(w_heads)[a_tot:] == 0)
    assert np.all(np.asarray(b_heads)[a_tot:] == 0)

    return dict(
        w_conv=w_conv.astype(jnp.bfloat16),   # bf16 MXU operands
        b_conv=b_conv,                        # f32 bias (elementwise path)
        w_heads=w_heads.astype(jnp.bfloat16),
        b_heads=b_heads,
        a_pad=a_pad,
    )


# ----------------------------------------------------------------------------
# GeneralizedRCNN forward (synthetic, self-contained)
# ----------------------------------------------------------------------------
def generalized_rcnn_forward(features, targets, params):
    """features: {'blocks': [..., (N,C,H,W), ...]};  uses blocks[2:3].
       targets: per-image dicts with 'mask2d' (T,Hm,Wm), 'mask2d_instance' (T,),
       'bbox' (T,4) and synthetic 'proposals'.  Returns (losses, results)."""
    losses = {}

    # features = features['blocks'][2:3]
    feat = features['blocks'][2]                       # (N, C, H, W) NCHW
    N, C, H, W = feat.shape

    # ---- RPN head (Pallas hot path) ----
    # NOTE: bf16 weights/activations differ from the f32 torch conv by ~2-3
    # decimal digits; validate against the reference with a tolerance.
    head_out = rpn_head_pallas(feat, params['w_conv'], params['b_conv'],
                               params['w_heads'], params['b_heads'])
    # head_out: (N, A_pad, H*W) — transposed, lane-dense.  The sigmoid/top_k
    # and the mean-based surrogate losses are layout-agnostic, so no
    # post-kernel transpose/reshape HBM round trips are needed.
    cls_rows = head_out[:, :NUM_ANCHORS, :]                        # (N,3,H*W)
    reg_rows = head_out[:, NUM_ANCHORS:NUM_ANCHORS + 4 * NUM_ANCHORS, :]
    obj_prob = jax.nn.sigmoid(cls_rows)

    # TODO(synk): true RPN losses need anchor generation + target assignment +
    # NMS, which have no clean Pallas equivalent; simple surrogates here.
    losses['loss_objectness'] = jnp.mean(
        -jnp.log(jnp.clip(1.0 - obj_prob, 1e-6, 1.0)))
    losses['loss_rpn_box_reg'] = jnp.mean(jnp.abs(reg_rows)) * 0.1

    # TODO(synk): roi_heads (box/mask heads + NMS) omitted (config-dependent).

    # ---- Synthetic "results_detection" (proposals) per image ----
    score_key = 'objectness'   # training / validate path
    results_detection = []
    obj_flat = obj_prob.reshape(N, -1)
    for n in range(N):
        prop = dict(targets[n]['proposals'])
        P = prop['bbox'].shape[0]
        prop['objectness'] = jax.lax.top_k(obj_flat[n], P)[0]
        results_detection.append(prop)

    # ---- match_process: batched mask IoU (one Pallas launch, one host sync) ----
    T_list = [int(t['mask2d'].shape[0]) for t in targets]
    P_list = [int(r['mask2d'].shape[0]) for r in results_detection]
    Hm, Wm = targets[0]['mask2d'].shape[1], targets[0]['mask2d'].shape[2]
    HW = Hm * Wm
    # +1 leaves room for the ones row (area fold) riding in the padding.
    Tpad = _round_up(max(T_list) + 1, 8)       # sublane-aligned
    Ppad = _round_up(max(P_list) + 1, 128)     # lane-dense IoU output

    # Assemble the batch once in numpy (bf16, masks are exactly {0,1}) and do
    # a single device_put — no per-image .at[].set() full-buffer copies.
    host_t_masks = jax.device_get([t['mask2d'] for t in targets])
    host_p_masks = jax.device_get([r['mask2d'] for r in results_detection])
    t_np = np.zeros((N, Tpad, HW), dtype=jnp.bfloat16)
    p_np = np.zeros((N, Ppad, HW), dtype=jnp.bfloat16)
    t_np[:, Tpad - 1, :] = 1
    p_np[:, Ppad - 1, :] = 1
    for n in range(N):
        t_np[n, :T_list[n]] = np.asarray(host_t_masks[n], np.float32) \
            .reshape(T_list[n], HW).astype(jnp.bfloat16)
        p_np[n, :P_list[n]] = np.asarray(host_p_masks[n], np.float32) \
            .reshape(P_list[n], HW).astype(jnp.bfloat16)
    iou_all = np.asarray(jax.device_get(
        mask_iou_pallas(jnp.asarray(t_np), jnp.asarray(p_np))))
    tgt_locs_all = jax.device_get([t['mask2d_instance'] for t in targets])

    # TODO(synk): greedy, order-dependent proposal<->target matching loop stays
    # on the host (data-dependent control flow over tiny index sets).
    boxes_matched, masks_matched, raw_matched = [], [], []
    loc_matched, lbl_matched, score_matched = [], [], []
    for n, (prop, tgt) in enumerate(zip(results_detection, targets)):
        Tn, Pn = T_list[n], P_list[n]
        iou = iou_all[n, :Tn, :Pn]
        tgt_locs = np.asarray(tgt_locs_all[n])
        matched_proposal_indices, locations = [], []
        for ti in range(Tn):
            for pi in range(Pn):
                if pi in matched_proposal_indices:
                    continue
                if iou[ti, pi] > MATCHING_OVERLAP_THRESHOLD:
                    locations.append(int(tgt_locs[ti]))
                    matched_proposal_indices.append(pi)
                    break
        idx = jnp.asarray(matched_proposal_indices, dtype=jnp.int32)
        boxes_matched.append(prop['bbox'][idx])
        masks_matched.append(prop['mask2d'][idx])
        raw_matched.append(prop['mask2draw'][idx])
        loc_matched.append(jnp.asarray(locations, dtype=jnp.int32))
        lbl_matched.append(prop['label'][idx])
        score_matched.append(prop['objectness'][idx])

    results = {
        'boxes': boxes_matched,
        'masks': masks_matched,
        'raw': raw_matched,
        'locations': [loc - 1 for loc in loc_matched],
        'label': lbl_matched,
        score_key: score_matched,
    }

    for name, loss in losses.items():
        losses[name] = LOSS_WEIGHT * loss
    return losses, results


# ----------------------------------------------------------------------------
# Synthetic data construction
# ----------------------------------------------------------------------------
def rect_mask(Hm, Wm, y0, x0, h, w):
    ys = jnp.arange(Hm)[:, None]
    xs = jnp.arange(Wm)[None, :]
    return ((ys >= y0) & (ys < y0 + h) & (xs >= x0) & (xs < x0 + w)
            ).astype(jnp.float32)


def build_synthetic_inputs(key, N=2, C=32, H=16, W=16, Hm=32, Wm=32, T=3, P=6):
    kf, _ = jax.random.split(key)
    blocks = [
        jax.random.normal(kf, (N, C // 4, H * 4, W * 4), jnp.float32),
        jax.random.normal(kf, (N, C // 2, H * 2, W * 2), jnp.float32),
        jax.random.normal(kf, (N, C, H, W), jnp.float32),        # used block
        jax.random.normal(kf, (N, C * 2, H // 2, W // 2), jnp.float32),
    ]
    features = {'blocks': blocks}

    targets = []
    for n in range(N):
        t_masks, t_boxes = [], []
        for t in range(T):
            y0, x0, h, w = 2 + 6 * t, 3 + 5 * t + 2 * n, 8, 8
            t_masks.append(rect_mask(Hm, Wm, y0, x0, h, w))
            t_boxes.append([x0, y0, x0 + w, y0 + h])
        t_masks = jnp.stack(t_masks)
        # proposals: first T are targets shifted by 1px (IoU > 0.5), rest random
        p_masks, p_boxes = [], []
        for t in range(T):
            y0, x0, h, w = 3 + 6 * t, 4 + 5 * t + 2 * n, 8, 8
            p_masks.append(rect_mask(Hm, Wm, y0, x0, h, w))
            p_boxes.append([x0, y0, x0 + w, y0 + h])
        for e in range(P - T):
            y0, x0 = 20 + e, 1 + 3 * e
            p_masks.append(rect_mask(Hm, Wm, y0, x0, 3, 3))
            p_boxes.append([x0, y0, x0 + 3, y0 + 3])
        p_masks = jnp.stack(p_masks)
        targets.append({
            'mask2d': t_masks,
            'mask2d_instance': jnp.arange(1, T + 1, dtype=jnp.int32),
            'bbox': jnp.asarray(t_boxes, jnp.float32),
            'proposals': {
                'bbox': jnp.asarray(p_boxes, jnp.float32),
                'mask2d': p_masks,
                'mask2draw': p_masks * 0.9 + 0.05,   # soft "raw" masks
                'label': jnp.arange(1, P + 1, dtype=jnp.int32),
            },
        })
    return features, targets


if __name__ == "__main__":
    key = jax.random.PRNGKey(0)
    kp, kd = jax.random.split(key)

    C = 32  # in_channels[2]
    params = init_rpn_params(kp, C, NUM_ANCHORS)
    features, targets = build_synthetic_inputs(kd, N=2, C=C, H=16, W=16)

    losses, results = generalized_rcnn_forward(features, targets, params)

    # Block on everything device-side.
    jax.block_until_ready(losses['loss_objectness'])
    jax.block_until_ready(losses['loss_rpn_box_reg'])
    for b in results['boxes']:
        jax.block_until_ready(b)
    for m in results['masks']:
        jax.block_until_ready(m)

    # Basic sanity: each image should have matched all 3 shifted proposals.
    assert all(int(b.shape[0]) == 3 for b in results['boxes'])
    assert all(int(l.shape[0]) == 3 for l in results['locations'])
    assert np.all(np.isfinite(np.asarray(losses['loss_objectness'])))
    print("KERNEL_OK")
</pallas_src>

<mosaic_0001>
module attributes {stable_mosaic.version = 11 : i64} {
  func.func @_rpn_head_kernel(%arg0: i32, %arg1: i32, %arg2: memref<1x18x18x32xbf16, #tpu.memory_space<vmem>>, %arg3: memref<288x32xbf16, #tpu.memory_space<vmem>>, %arg4: memref<1x32xf32, #tpu.memory_space<vmem>>, %arg5: memref<16x32xbf16, #tpu.memory_space<vmem>>, %arg6: memref<16x1xf32, #tpu.memory_space<vmem>>, %arg7: memref<1x16x128xf32, #tpu.memory_space<vmem>>) attributes {dimension_semantics = [#tpu.dimension_semantics<parallel>, #tpu.dimension_semantics<parallel>], iteration_bounds = array<i64: 2, 2>, scalar_prefetch = 0 : i64, scratch_operands = 0 : i64, tpu.core_type = #tpu.core_type<tc>, window_params = [{transform_indices = @transform_0, window_bounds = array<i64: 1, 18, 18, 32>}, {pipeline_mode = #tpu.pipeline_mode<synchronous>, transform_indices = @transform_1, window_bounds = array<i64: 288, 32>}, {pipeline_mode = #tpu.pipeline_mode<synchronous>, transform_indices = @transform_2, window_bounds = array<i64: 1, 32>}, {pipeline_mode = #tpu.pipeline_mode<synchronous>, transform_indices = @transform_3, window_bounds = array<i64: 16, 32>}, {pipeline_mode = #tpu.pipeline_mode<synchronous>, transform_indices = @transform_4, window_bounds = array<i64: 16, 1>}, {transform_indices = @transform_5, window_bounds = array<i64: 1, 16, 128>}]} {
    %c8_i32 = arith.constant 8 : i32
    %0 = arith.muli %arg1, %c8_i32 : i32
    %1 = tpu.assume_multiple %0, 8 : i32
    %c0 = arith.constant 0 : index
    %2 = arith.index_cast %1 : i32 to index
    %c0_0 = arith.constant 0 : index
    %c0_1 = arith.constant 0 : index
    %3 = vector.load %arg2[%c0, %2, %c0_0, %c0_1] : memref<1x18x18x32xbf16, #tpu.memory_space<vmem>>, vector<1x10x18x32xbf16>
    %4 = vector.shape_cast %3 : vector<1x10x18x32xbf16> to vector<10x18x32xbf16>
    %5 = vector.extract_strided_slice %4 {offsets = [0, 0, 0], sizes = [8, 16, 32], strides = [1, 1, 1]} : vector<10x18x32xbf16> to vector<8x16x32xbf16>
    %6 = vector.extract_strided_slice %4 {offsets = [0, 1, 0], sizes = [8, 16, 32], strides = [1, 1, 1]} : vector<10x18x32xbf16> to vector<8x16x32xbf16>
    %7 = vector.extract_strided_slice %4 {offsets = [0, 2, 0], sizes = [8, 16, 32], strides = [1, 1, 1]} : vector<10x18x32xbf16> to vector<8x16x32xbf16>
    %8 = vector.extract_strided_slice %4 {offsets = [1, 0, 0], sizes = [8, 16, 32], strides = [1, 1, 1]} : vector<10x18x32xbf16> to vector<8x16x32xbf16>
    %9 = vector.extract_strided_slice %4 {offsets = [1, 1, 0], sizes = [8, 16, 32], strides = [1, 1, 1]} : vector<10x18x32xbf16> to vector<8x16x32xbf16>
    %10 = vector.extract_strided_slice %4 {offsets = [1, 2, 0], sizes = [8, 16, 32], strides = [1, 1, 1]} : vector<10x18x32xbf16> to vector<8x16x32xbf16>
    %11 = vector.extract_strided_slice %4 {offsets = [2, 0, 0], sizes = [8, 16, 32], strides = [1, 1, 1]} : vector<10x18x32xbf16> to vector<8x16x32xbf16>
    %12 = vector.extract_strided_slice %4 {offsets = [2, 1, 0], sizes = [8, 16, 32], strides = [1, 1, 1]} : vector<10x18x32xbf16> to vector<8x16x32xbf16>
    %13 = vector.extract_strided_slice %4 {offsets = [2, 2, 0], sizes = [8, 16, 32], strides = [1, 1, 1]} : vector<10x18x32xbf16> to vector<8x16x32xbf16>
    %14 = tpu.concatenate %5, %6, %7, %8, %9, %10, %11, %12, %13 in 2 : vector<8x16x32xbf16>, vector<8x16x32xbf16>, vector<8x16x32xbf16>, vector<8x16x32xbf16>, vector<8x16x32xbf16>, vector<8x16x32xbf16>, vector<8x16x32xbf16>, vector<8x16x32xbf16>, vector<8x16x32xbf16> -> vector<8x16x288xbf16>
    %15 = vector.shape_cast %14 : vector<8x16x288xbf16> to vector<128x288xbf16>
    %c0_2 = arith.constant 0 : index
    %c0_3 = arith.constant 0 : index
    %16 = vector.load %arg3[%c0_2, %c0_3] : memref<288x32xbf16, #tpu.memory_space<vmem>>, vector<288x32xbf16>
    %cst = arith.constant dense<0.000000e+00> : vector<128x32xf32>
    %17 = tpu.matmul %15, %16, %cst {dimension_numbers = #tpu.dot_dimension_numbers<[1], [0], [0], [1], [0, 0, 1, 1], [], []>} : vector<128x288xbf16>, vector<288x32xbf16>, vector<128x32xf32> -> vector<128x32xf32>
    %c0_4 = arith.constant 0 : index
    %c0_5 = arith.constant 0 : index
    %18 = vector.load %arg4[%c0_4, %c0_5] : memref<1x32xf32, #tpu.memory_space<vmem>>, vector<1x32xf32>
    %19 = vector.broadcast %18 : vector<1x32xf32> to vector<128x32xf32>
    %20 = arith.addf %17, %19 : vector<128x32xf32>
    %cst_6 = arith.constant 0.000000e+00 : f32
    %21 = vector.broadcast %cst_6 : f32 to vector<128x32xf32>
    %22 = arith.maximumf %20, %21 : vector<128x32xf32>
    %c0_7 = arith.constant 0 : index
    %c0_8 = arith.constant 0 : index
    %23 = vector.load %arg5[%c0_7, %c0_8] : memref<16x32xbf16, #tpu.memory_space<vmem>>, vector<16x32xbf16>
    %24 = arith.truncf %22 : vector<128x32xf32> to vector<128x32xbf16>
    %cst_9 = arith.constant dense<0.000000e+00> : vector<16x128xf32>
    %25 = tpu.matmul %23, %24, %cst_9 {dimension_numbers = #tpu.dot_dimension_numbers<[1], [1], [0], [0], [0, 0, 1, 0], [], []>} : vector<16x32xbf16>, vector<128x32xbf16>, vector<16x128xf32> -> vector<16x128xf32>
    %c0_10 = arith.constant 0 : index
    %c0_11 = arith.constant 0 : index
    %26 = vector.load %arg6[%c0_10, %c0_11] : memref<16x1xf32, #tpu.memory_space<vmem>>, vector<16x1xf32>
    %27 = vector.broadcast %26 : vector<16x1xf32> to vector<16x128xf32>
    %28 = arith.addf %25, %27 : vector<16x128xf32>
    %c0_12 = arith.constant 0 : index
    %c0_13 = arith.constant 0 : index
    %c0_14 = arith.constant 0 : index
    %29 = vector.load %arg7[%c0_12, %c0_13, %c0_14] : memref<1x16x128xf32, #tpu.memory_space<vmem>>, vector<1x16x128xf32>
    %30 = vector.shape_cast %29 : vector<1x16x128xf32> to vector<16x128xf32>
    %31 = vector.shape_cast %28 : vector<16x128xf32> to vector<1x16x128xf32>
    tpu.vector_store %arg7[%c0_12, %c0_13, %c0_14], %31 {strides = array<i32>} : memref<1x16x128xf32, #tpu.memory_space<vmem>>, vector<1x16x128xf32>,
    return
  }
  func.func @transform_0(%arg0: i32, %arg1: i32) -> (i32, i32, i32, i32) {
    %c0_i32 = arith.constant 0 : i32
    %c0_i32_0 = arith.constant 0 : i32
    %c0_i32_1 = arith.constant 0 : i32
    %c0_i32_2 = arith.constant 0 : i32
    return %arg0, %c0_i32, %c0_i32_0, %c0_i32_1 : i32, i32, i32, i32
  }
  func.func @transform_1(%arg0: i32, %arg1: i32) -> (i32, i32) {
    %c0_i32 = arith.constant 0 : i32
    %c0_i32_0 = arith.constant 0 : i32
    %c0_i32_1 = arith.constant 0 : i32
    return %c0_i32, %c0_i32_0 : i32, i32
  }
  func.func @transform_2(%arg0: i32, %arg1: i32) -> (i32, i32) {
    %c0_i32 = arith.constant 0 : i32
    %c0_i32_0 = arith.constant 0 : i32
    %c0_i32_1 = arith.constant 0 : i32
    return %c0_i32, %c0_i32_0 : i32, i32
  }
  func.func @transform_3(%arg0: i32, %arg1: i32) -> (i32, i32) {
    %c0_i32 = arith.constant 0 : i32
    %c0_i32_0 = arith.constant 0 : i32
    %c0_i32_1 = arith.constant 0 : i32
    return %c0_i32, %c0_i32_0 : i32, i32
  }
  func.func @transform_4(%arg0: i32, %arg1: i32) -> (i32, i32) {
    %c0_i32 = arith.constant 0 : i32
    %c0_i32_0 = arith.constant 0 : i32
    %c0_i32_1 = arith.constant 0 : i32
    return %c0_i32, %c0_i32_0 : i32, i32
  }
  func.func @transform_5(%arg0: i32, %arg1: i32) -> (i32, i32, i32) {
    %c0_i32 = arith.constant 0 : i32
    %c0_i32_0 = arith.constant 0 : i32
    return %arg0, %c0_i32, %arg1 : i32, i32, i32
  }
}

</mosaic_0001>

<bundles_post_ra>
// kernel: tpu_custom_call.1
= control target key start
LH: loop header
LB: loop body
LE: loop exit
PB: predicated region body
PF: predicated region fallthrough
CT: control target
= control target key end

     0   :  { %10 = vsyncpa [#allocation3], 0  ;;  %s2256_s0 = inlined_call_operand.vmem [shape: bf16[2,18,18,32], index: 0, kind: input, shape index: {}]   ;;  %s2257_s1 = inlined_call_operand.vmem [shape: bf16[288,32], index: 1, kind: input, shape index: {}]   ;;  %s2258_s2 = inlined_call_operand.vmem [shape: f32[1,32], index: 2, kind: input, shape index: {}]   ;;  %s2259_s3 = inlined_call_operand.vmem [shape: bf16[16,32], index: 3, kind: input, shape index: {}]   ;;  %s2260_s4 = inlined_call_operand.vmem [shape: f32[16,1], index: 4, kind: input, shape index: {}]   ;;  %s2261_s5 = inlined_call_operand.hbm [shape: f32[2,16,256], index: 5, kind: output, shape index: {}]  }
   0x1   :  { %12 = vsyncpa [#allocation3 + $0x1], 0  ;;  %s1741_s18 = smov 0   ;;  %s1743_s19 = smov 0  }
   0x2   :  { %s1745_s20 = smov 0   ;;  %s1747_s21 = smov 0  }
   0x3   :  { %s1749_s22 = smov 0   ;;  %s1751_s23 = smov 0  }
   0x4   :  { %s1753_s24 = smov 0   ;;  %s1755_s25 = smov 0  }
   0x5 LB: > { %s1297_s26 = sadd.s32 4294967295, %s1699_s25   ;;  %s1298_s27 = sadd.s32 4294967294, %s1699_s25   ;;  %s1699_s25 = sphi %s1755_s25, %s18_s25   ;;  %s1695_s24 = sphi %s1753_s24, %s2276_s24   ;;  %s1691_s23 = sphi %s1751_s23, %s2275_s23   ;;  %s1687_s22 = sphi %s1749_s22, %s2274_s22   ;;  %s1683_s21 = sphi %s1747_s21, %s2273_s21   ;;  %s1679_s20 = sphi %s1745_s20, %s2272_s20   ;;  %s1675_s19 = sphi %s1743_s19, %s2271_s19   ;;  %s1671_s18 = sphi %s1741_s18, %s2270_s18  }
   0x6   : > { %s27_s28 = sadd.s32 1, %s1691_s23  ;;  %s30_s29 = sadd.s32 1, %s1695_s24 }
   0x7   : > { %p28_p0 = scmp.ge.s32.totalorder %s27_s28, 2  ;;  %p159_p1 = scmp.ne.s32.totalorder %s1679_s20, %s1675_s19 }
   0x8   : > { %p160_p2 = scmp.eq.s32.totalorder %s1297_s26, 3  ;;  %p165_p5 = scmp.ne.s32.totalorder %s1675_s19, %s1671_s18 }
   0x9   : > { %s2278_s28 = smov (%p28_p0, %s27_s28), 0  ;;  %s2280_s29 = smov (!%p28_p0, %s30_s29), %s1695_s24 }
   0xa   : > { %2264 = sst [smem:[#allocation5_spill]] %s2278_s28  ;;  %s145_s30 = ssub.s32 %s1691_s23, %s2278_s28 }
   0xb   : > { %p1792_p3 = por %p160_p2, %p159_p1  ;;  %p32_p4 = scmp.ge.s32.totalorder %s2280_s29, 2 }
   0xc   : > { %p166_p6 = scmp.eq.s32.totalorder %s1298_s27, 3  ;;  %p1301_p7 = scmp.ge.s32.totalorder %s1699_s25, 1 }
   0xd   : > { %s2282_s29 = smov (%p32_p4, %s2280_s29), 0  ;;  %p204_p9 = scmp.lt.s32.totalorder %s1699_s25, 5 }
   0xe   : > { %2266 = sst [smem:[#allocation6_spill]] %s2282_s29  ;;  %p1801_p8 = por %p166_p6, %p165_p5 }
   0xf   : > { %s144_s8 = ssub.s32 %s1695_s24, %s2282_s29  ;;  %s149_s9 = sadd.s32 1, %s1679_s20 }
  0x10   : > { %s146_s10 = sor.u32 %s145_s30, %s144_s8  ;;  %p205_p10 = pnand %p1301_p7, %p204_p9 }
  0x11   : > { %p147_p11 = scmp.eq.s32.totalorder %s146_s10, 0  ;;  %p232_p12 = scmp.lt.s32.totalorder (!%p205_p10), %s1687_s22, 1 }
  0x12   : > { %208 = sbr.rel (%p205_p10) target bundleno = 726 (0x2d6), region = 40  ;;  %s1701_s28 = smov (!%p205_p10), 64  }
  0x13   : > { %s1810_s11 = scalar_select %p147_p11, %s1679_s20, %s149_s9  }
  0x14   : > { %s1361_s17 = smul.u32 (!%p205_p10), 96, %s1683_s21  ;;  %s1702_s29 = smov (!%p205_p10), 96  }
  0x15   : > { %s1357_s16 = sshll.u32 (!%p205_p10), %s1687_s22, 2  ;;  %s1707_s9 = smov (!%p205_p10), [#allocation2]  }
  0x16   : > { %s1217_s27 = sadd.s32 (!%p205_p10), %s1683_s21, %s1357_s16  ;;  %s1611_s10 = sshll.u32 (!%p205_p10), %s1707_s9, 4  ;;  %s1612_s10 = int_to_ptr.vmem [resolvable:$false] %s1611_s10 }
  0x17   : > { %v1588_v0 = vld [vmem:[%s2257_s1 + $0x78] sm:$0xff]   ;;  %s233_s14 = scalar_select %p232_p12, %s1687_s22, 1  ;;  %v1590_v2 = vld [vmem:[%s2257_s1 + $0x70] sm:$0xff]   ;;  %v1592_v4 = vld [vmem:[%s2257_s1 + $0x68] sm:$0xff]   ;;  %vm449_vm0 = vcmask 1046528   ;;  %vm600_vm2 = vcmask 261120  }
  0x18   : > { %1362 = vmatprep.subr.bf16.mxu0 %v1588_v0  ;;  %v1589_v1 = vld [vmem:[%s2257_s1 + $0x38] sm:$0xff]   ;;  %v1591_v3 = vld [vmem:[%s2257_s1 + $0x30] sm:$0xff]   ;;  %v1593_v5 = vld [vmem:[%s2257_s1 + $0x28] sm:$0xff]   ;;  %vm336_vm1 = vsmask.f32 7424  ;;  %vm617_vm3 = vcmask 523264  }
  0x19   : > { %s1485_s30 = smul.u32 216, %s233_s14  ;;  %1363 = vmatpush3.bf16.msra.mxu0 %v1589_v1  ;;  %v1594_v6 = vld [vmem:[%s2257_s1 + $0x60] sm:$0xff]   ;;  %v1596_v55 = vld [vmem:[%s2257_s1 + $0x58] sm:$0xff]   ;;  %vm634_vm4 = vcmask 785408   ;;  %vm1705_vm5 = vmmov 0   ;;  %s1613_s12 = scalar_lea.vmem %s1612_s10, 512 }
  0x1a   : > { %1364 = vmatprep.subr.bf16.mxu0 %v1590_v2  ;;  %v1595_v52 = vld [vmem:[%s2257_s1 + $0x20] sm:$0xff]   ;;  %v1597_v2 = vld [vmem:[%s2257_s1 + $0x18] sm:$0xff]  }
  0x1b   : > { %s236_s15 = scalar_lea.vmem %s2256_s0, %s1485_s30 }
  0x1c   : > { %s1836_s14 = scalar_lea.vmem %s236_s15, %s1361_s17  ;;  %s1703_s17 = smov 32  }
  0x1d   : > { %v1842_v7 = vld [vmem:[%s1836_s14 + $0x24] sm:$0xff]   ;;  %1365 = vmatpush3.bf16.msra.mxu0 %v1591_v3  ;;  %v1845_v8 = vld [vmem:[%s1836_s14 + $0x18] sm:$0xff]   ;;  %v1850_v9 = vld [vmem:[%s1836_s14 + $0xc] sm:$0xff]   ;;  %s229_s15 = sand.u32 1, %s1675_s19  }
  0x1e   : > { %1366 = vmatprep.subr.bf16.mxu0 %v1592_v4  ;;  %552 = vrot.lane.b32.xlu0 %v1842_v7, %s1701_s28  ;;  %v1571_v10 = vld [vmem:[%s1836_s14 + $0x14] ss:$0 sps:$4 sm:$0x11]   ;;  %v456_v11 = vrot.slane %v1845_v8, 1  ;;  %v453_v12 = vrot.slane %v1850_v9, 1  ;;  %v1859_v15 = vld [vmem:[%s1836_s14] sm:$0xff]  }
  0x1f   : > { %550 = vrot.lane.b32.xlu1 %v1845_v8, %s1701_s28  ;;  %v1572_v13 = vld [vmem:[%s1836_s14 + $0x20] ss:$0 sps:$4 sm:$0x11]   ;;  %v454_v14 = vrot.slane %v1571_v10, 1  ;;  %v450_v19 = vrot.slane %v1859_v15, 1  ;;  %v338_v20 = vshrl.u32 %v1859_v15, 16 }
  0x20   : > { %v457_v16 = vrot.slane %v1572_v13, 1  ;;  %v1574_v17 = vld [vmem:[%s1836_s14 + $0x8] ss:$0 sps:$4 sm:$0x11]   ;;  %v340_v21 = vshll.u32 %v1859_v15, 16  ;;  %v350_v25 = vshrl.u32 %v1850_v9, 16 }
  0x21   : > { %1367 = vmatpush3.bf16.msra.mxu0 %v1593_v5  ;;  %v455_v18 = vsel %vm449_vm0, %v453_v12, %v454_v14  ;;  %v451_v23 = vrot.slane %v1574_v17, 1  ;;  %v345_v24 = vshll.u32 %v1574_v17, 16  ;;  %v1575_v26 = vld [vmem:[%s1836_s14 + $0x2c] ss:$0 sps:$4 sm:$0x11]   ;;  %v352_v28 = vshll.u32 %v1850_v9, 16 }
  0x22   : > { %1368 = vmatprep.subr.bf16.mxu0 %v1594_v6  ;;  %529 = vrot.lane.b32.xlu0 %v455_v18, %s1703_s17  ;;  %v1870_v22 = vsel %vm449_vm0, %v456_v11, %v457_v16  ;;  %v342_v27 = vrot.slane %v340_v21, 1  ;;  %v357_v29 = vshll.u32 %v1571_v10, 16  ;;  %v362_v30 = vshrl.u32 %v1845_v8, 16  ;;  %v1895_v51 = vld [vmem:[%s1836_s14 + $0x30] sm:$0xff]   ;;  %v1923_v0 = vld [vmem:[%s1836_s14 + $0x3c] sm:$0xff]   ;;  %s1302_s26 = sshll.u32 %s229_s15, 4 }
  0x23   : > { %495 = vrot.lane.b32.xlu1 %v1850_v9, %s1702_s29  ;;  %1449 = vmatprep.mubr.msk.bf16.mxu1 %vm600_vm2, %v1870_v22  ;;  %v452_v31 = vsel %vm449_vm0, %v450_v19, %v451_v23  ;;  %v347_v32 = vrot.slane %v345_v24, 1  ;;  %v364_v33 = vshll.u32 %v1845_v8, 16  ;;  %v369_v34 = vshll.u32 %v1572_v13, 16  ;;  %v1577_v53 = vld [vmem:[%s1836_s14 + $0x38] ss:$0 sps:$4 sm:$0x11]  }
  0x24   : > { %v343_v35 = vor.u32 %v342_v27, %v338_v20  ;;  %v354_v36 = vrot.slane %v352_v28, 1  ;;  %v376_v37 = vshll.u32 %v1842_v7, 16  ;;  %v359_v38 = vrot.slane %v357_v29, 1  ;;  %v1918_v60 = vld [vmem:[%s1836_s14 + $0x6c] sm:$0xff]   ;;  %s231_s30 = scalar_lea.vmem [#allocation2], %s1302_s26  ;;  %s2205_s21 = scalar_lea.sflag [#allocation3], %s229_s15 }
  0x25   : > { %v366_v39 = vrot.slane %v364_v33, 1  ;;  %v371_v40 = vrot.slane %v369_v34, 1  ;;  %v374_v41 = vshrl.u32 %v1842_v7, 16  ;;  %v381_v45 = vshll.u32 %v1575_v26, 16  ;;  %1369 = vmatpush3.bf16.msra.mxu0 %v1595_v52  ;;  %v1598_v11 = vld [vmem:[%s2257_s1 + $0x50] sm:$0xff]   ;;  %v1600_v20 = vld [vmem:[%s2257_s1 + $0x48] sm:$0xff]  }
  0x26   : > { %531 = vrot.lane.b32.xlu0 %v1870_v22, %s1703_s17  ;;  %v348_v42 = vsel %vm336_vm1, %v343_v35, %v347_v32  ;;  %v355_v43 = vor.u32 %v354_v36, %v350_v25  ;;  %v378_v44 = vrot.slane %v376_v37, 1  ;;  %v459_v54 = vrot.slane %v1842_v7, 1  ;;  %1370 = vmatprep.subr.bf16.mxu0 %v1596_v55  ;;  %v1932_v5 = vld [vmem:[%s1836_s14 + $0x74] ss:$0 sps:$4 sm:$0x11]   ;;  %v1603_v28 = vld [vmem:[%s2257_s1 + $0x88] sm:$0xff]  }
  0x27   : > { %474 = vrot.lane.b32.xlu1 %v452_v31, %s1701_s28  ;;  %v367_v46 = vor.u32 %v366_v39, %v362_v30  ;;  %v383_v50 = vrot.slane %v381_v45, 1  ;;  %v460_v57 = vrot.slane %v1575_v26, 1  ;;  %v388_v58 = vshll.u32 %v1895_v51, 16  ;;  %v1579_v16 = vld [vmem:[%s1836_s14 + $0x44] ss:$0 sps:$4 sm:$0x11]   ;;  %1445 = vmatprep.subr.bf16.mxu1 %v1603_v28 }
  0x28   : > { %v1889_v47 = vsel %vm336_vm1, %v355_v43, %v359_v38  ;;  %v379_v49 = vor.u32 %v378_v44, %v374_v41  ;;  %v393_v59 = vshll.u32 %v1577_v53, 16  ;;  %v386_v62 = vshrl.u32 %v1895_v51, 16  ;;  %v1602_v26 = vld [vmem:[%s2257_s1 + $0x40] sm:$0xff]   ;;  %1446 = vmatpush3.bf16.msra.mxu1 %v1603_v28  ;;  %v1984_v35 = vld [vmem:[%s1836_s14 + $0x48] sm:$0xff]   ;;  %v2008_v52 = vld [vmem:[%s1836_s14 + $0x54] sm:$0xff]   ;;  %s1220_s8 = sshll.u32 %s231_s30, 4  ;;  %s2198_s8 = int_to_ptr.vmem [resolvable:$true] %s1220_s8 }
  0x29   : > { %v1892_v48 = vsel %vm336_vm1, %v367_v46, %v371_v40  ;;  %v461_v61 = vsel %vm449_vm0, %v459_v54, %v460_v57  ;;  %v390_v63 = vrot.slane %v388_v58, 1  ;;  %v462_v1 = vrot.slane %v1895_v51, 1  ;;  %1371 = vmatpush3.bf16.msra.mxu0 %v1597_v2  ;;  %v1604_v31 = vld [vmem:[%s2257_s1] sm:$0xff]   ;;  %v1581_v39 = vld [vmem:[%s1836_s14 + $0x50] ss:$0 sps:$4 sm:$0x11]   ;;  %p1614_p2 = scmp.lt.s32.totalorder %s2198_s8, %s1612_s10 }
  0x2a   : > { %433 = vrot.lane.b32.xlu0 %v348_v42, %s1703_s17  ;;  %v1910_v56 = vsel %vm336_vm1, %v379_v49, %v383_v50  ;;  %v395_v3 = vrot.slane %v393_v59, 1  ;;  %v463_v4 = vrot.slane %v1577_v53, 1  ;;  %v570_v6 = vshrl.u32 %v1918_v60, 16  ;;  %1372 = vmatprep.subr.bf16.mxu0 %v1598_v11  ;;  %v1605_v32 = vld [vmem:[%s2257_s1 + $0x80] sm:$0xff]  }
  0x2b   : > { %476 = vrot.lane.b32.xlu1 %v455_v18, %s1701_s28  ;;  %v572_v10 = vshll.u32 %v1918_v60, 16  ;;  %v391_v12 = vor.u32 %v390_v63, %v386_v62  ;;  %v400_v13 = vshll.u32 %v1923_v0, 16  ;;  %v577_v14 = vshll.u32 %v1932_v5, 16  ;;  %v1599_v18 = vld [vmem:[%s2257_s1 + $0x10] sm:$0xff]   ;;  %1447 = vmatprep.subr.bf16.mxu1 %v1605_v32  ;;  %v1584_v55 = vld [vmem:[%s1836_s14 + $0x60] sm:$0xff]  }
  0x2c   : > { %v398_v25 = vshrl.u32 %v1923_v0, 16  ;;  %v405_v27 = vshll.u32 %v1579_v16, 16  ;;  %v464_v29 = vsel %vm449_vm0, %v462_v1, %v463_v4  ;;  %1448 = vmatpush3.bf16.msra.mxu1 %v1605_v32  ;;  %v465_v37 = vrot.slane %v1923_v0, 1  ;;  %v1583_v54 = vld [vmem:[%s1836_s14 + $0x5c] ss:$0 sps:$4 sm:$0x11]  }
  0x2d   : > { %v574_v17 = vrot.slane %v572_v10, 1  ;;  %v579_v19 = vrot.slane %v577_v14, 1  ;;  %1373 = vmatpush3.bf16.msra.mxu0 %v1599_v18  ;;  %v1954_v23 = vsel %vm336_vm1, %v391_v12, %v395_v3  ;;  %v402_v30 = vrot.slane %v400_v13, 1  ;;  %v1585_v57 = vld [vmem:[%s1836_s14 + $0x68] ss:$0 sps:$4 sm:$0x11]  }
  0x2e   : > { %581 = vrot.lane.b32.xlu0 %v1892_v48, %s1702_s29  ;;  %1374 = vmatprep.subr.bf16.mxu0 %v1600_v20  ;;  %v407_v34 = vrot.slane %v405_v27, 1  ;;  %v466_v38 = vrot.slane %v1579_v16, 1  ;;  %v412_v40 = vshll.u32 %v1984_v35, 16  ;;  %v410_v42 = vshrl.u32 %v1984_v35, 16  ;;  %s1358_s14 = sshll.u32 %s1217_s27, 7 }
  0x2f   : > { %435 = vrot.lane.b32.xlu1 %v1889_v47, %s1703_s17  ;;  %v575_v21 = vor.u32 %v574_v17, %v570_v6  ;;  %v403_v33 = vor.u32 %v402_v30, %v398_v25  ;;  %1450 = vmatmul.mubr.msk.bf16.vlgmr.msra.gmra.mxu1 %vm600_vm2, %v461_v61  ;;  %v417_v44 = vshll.u32 %v1581_v39, 16  ;;  %v468_v45 = vrot.slane %v1984_v35, 1 }
  0x30   : > { %1453 = vmatprep.mubr.msk.bf16.mxu1 %vm600_vm2, %v464_v29  ;;  %v467_v41 = vsel %vm449_vm0, %v465_v37, %v466_v38  ;;  %v414_v43 = vrot.slane %v412_v40, 1  ;;  %v469_v46 = vrot.slane %v1581_v39, 1  ;;  %v424_v59 = vshll.u32 %v2008_v52, 16 }
  0x31   : > { %v1957_v24 = vsel %vm336_vm1, %v575_v21, %v579_v19  ;;  %v1990_v36 = vsel %vm336_vm1, %v403_v33, %v407_v34  ;;  %v419_v50 = vrot.slane %v417_v44, 1  ;;  %v472_v62 = vrot.slane %v1583_v54, 1 }
  0x32   : > { %583 = vrot.lane.b32.xlu0 %v1910_v56, %s1702_s29  ;;  %v415_v49 = vor.u32 %v414_v43, %v410_v42  ;;  %v470_v53 = vsel %vm449_vm0, %v468_v45, %v469_v46  ;;  %v526_v63 = vrot.slane %v1584_v55, 1  ;;  %v527_v1 = vrot.slane %v1585_v57, 1 }
  0x33   : > { %497 = vrot.lane.b32.xlu1 %v1845_v8, %s1702_s29  ;;  %v422_v2 = vshrl.u32 %v2008_v52, 16  ;;  %v426_v3 = vrot.slane %v424_v59, 1  ;;  %v429_v4 = vshll.u32 %v1583_v54, 16  ;;  %v517_v14 = vshll.u32 %v1584_v55, 16 }
  0x34   : > { %v2020_v58 = vsel %vm336_vm1, %v415_v49, %v419_v50  ;;  %v528_v10 = vsel %vm449_vm0, %v526_v63, %v527_v1  ;;  %v515_v16 = vshrl.u32 %v1584_v55, 16  ;;  %v522_v18 = vshll.u32 %v1585_v57, 16 }
  0x35   : > { %v427_v11 = vor.u32 %v426_v3, %v422_v2  ;;  %v431_v12 = vrot.slane %v429_v4, 1  ;;  %v519_v17 = vrot.slane %v517_v14, 1  ;;  %v597_v19 = vrot.slane %v1918_v60, 1 }
  0x36   : > { %533 = vrot.lane.b32.xlu0 %v461_v61, %s1703_s17  ;;  %v598_v20 = vrot.slane %v1932_v5, 1  ;;  %v524_v25 = vrot.slane %v522_v18, 1 }
  0x37   : > { %437 = vrot.lane.b32.xlu1 %v1892_v48, %s1703_s17  ;;  %1454 = vmatmul.mubr.msk.bf16.gmra.mxu1 %vm600_vm2, %v467_v41  ;;  %v2040_v13 = vsel %vm336_vm1, %v427_v11, %v431_v12 }
  0x38   : > { %1457 = vmatprep.mubr.msk.bf16.mxu1 %vm600_vm2, %v470_v53  ;;  %v599_v21 = vsel %vm449_vm0, %v597_v19, %v598_v20 }
  0x3a   : > { %554 = vrot.lane.b32.xlu0 %v1895_v51, %s1701_s28 }
  0x3b   : > { %478 = vrot.lane.b32.xlu1 %v1870_v22, %s1701_s28  ;;  %v1601_v22 = vld [vmem:[%s2257_s1 + $0x8] sm:$0xff]  }
  0x3c   : > { %1375 = vmatpush3.bf16.msra.mxu0 %v1601_v22  ;;  %v520_v22 = vor.u32 %v519_v17, %v515_v16 }
  0x3d   : > { %1376 = vmatprep.subr.bf16.mxu0 %v1602_v26 }
  0x3e   : > { %585 = vrot.lane.b32.xlu0 %v1954_v23, %s1702_s29  ;;  %v2056_v26 = vsel %vm336_vm1, %v520_v22, %v524_v25 }
  0x3f   : > { %499 = vrot.lane.b32.xlu1 %v1842_v7, %s1702_s29 }
  0x40   : > { %1377 = vmatpush3.bf16.msra.mxu0 %v1604_v31 }
  0x42   : > { %535 = vrot.lane.b32.xlu0 %v464_v29, %s1703_s17 }
  0x43   : > { %439 = vrot.lane.b32.xlu1 %v1910_v56, %s1703_s17 }
  0x46   : > { %556 = vrot.lane.b32.xlu0 %v1923_v0, %s1701_s28 }
  0x47   : > { %480 = vrot.lane.b32.xlu1 %v461_v61, %s1701_s28  ;;  %v471_v61 = vrot.slane %v2008_v52, 1 }
  0x49   : > { %v473_v6 = vsel %vm449_vm0, %v471_v61, %v472_v62 }
  0x4a   : > { %587 = vrot.lane.b32.xlu0 %v1990_v36, %s1702_s29  ;;  %1458 = vmatmul.mubr.msk.bf16.gmra.mxu1 %vm600_vm2, %v473_v6 }
  0x4b   : > { %501 = vrot.lane.b32.xlu1 %v1895_v51, %s1702_s29  ;;  %1461 = vmatprep.mubr.msk.bf16.mxu1 %vm600_vm2, %v528_v10 }
  0x4e   : > { %537 = vrot.lane.b32.xlu0 %v467_v41, %s1703_s17 }
  0x4f   : > { %441 = vrot.lane.b32.xlu1 %v1954_v23, %s1703_s17 }
  0x52   : > { %558 = vrot.lane.b32.xlu0 %v1984_v35, %s1701_s28  ;;  %1462 = vmatmul.mubr.msk.bf16.gmra.mxu1 %vm600_vm2, %v599_v21 }
  0x53   : > { %482 = vrot.lane.b32.xlu1 %v464_v29, %s1701_s28 }
  0x56   : > { %589 = vrot.lane.b32.xlu0 %v2020_v58, %s1702_s29 }
  0x57   : > { %503 = vrot.lane.b32.xlu1 %v1923_v0, %s1702_s29 }
  0x5a   : > { %539 = vrot.lane.b32.xlu0 %v470_v53, %s1703_s17 }
  0x5b   : > { %443 = vrot.lane.b32.xlu1 %v1990_v36, %s1703_s17 }
  0x5e   : > { %560 = vrot.lane.b32.xlu0 %v2008_v52, %s1701_s28 }
  0x5f   : > { %484 = vrot.lane.b32.xlu1 %v467_v41, %s1701_s28 }
  0x62   : > { %591 = vrot.lane.b32.xlu0 %v2040_v13, %s1702_s29 }
  0x63   : > { %505 = vrot.lane.b32.xlu1 %v1984_v35, %s1702_s29 }
  0x66   : > { %541 = vrot.lane.b32.xlu0 %v473_v6, %s1703_s17 }
  0x67   : > { %445 = vrot.lane.b32.xlu1 %v2020_v58, %s1703_s17 }
  0x6a   : > { %562 = vrot.lane.b32.xlu0 %v1584_v55, %s1701_s28 }
  0x6b   : > { %486 = vrot.lane.b32.xlu1 %v470_v53, %s1701_s28 }
  0x6e   : > { %593 = vrot.lane.b32.xlu0 %v2056_v26, %s1702_s29 }
  0x6f   : > { %507 = vrot.lane.b32.xlu1 %v2008_v52, %s1702_s29 }
  0x72   : > { %543 = vrot.lane.b32.xlu0 %v528_v10, %s1703_s17 }
  0x73   : > { %447 = vrot.lane.b32.xlu1 %v2040_v13, %s1703_s17  ;;  %s1607_s17 = scalar_lea.vmem %s2198_s8, 256 }
  0x74   : > { %p1608_p13 = scmp.ne.s32.totalorder %s2198_s8, %s1607_s17  ;;  %p1615_p4 = scmp.lt.s32.totalorder %s1613_s12, %s1607_s17 }
  0x76   : > { %564 = vrot.lane.b32.xlu0 %v1918_v60, %s1701_s28  ;;  %p1609_p0 = pnand %p1608_p13, %p1792_p3  ;;  %p1616_p5 = por %p1615_p4, %p1614_p2 }
  0x77   : > { %488 = vrot.lane.b32.xlu1 %v473_v6, %s1701_s28 }
  0x78   : > { %p1610_p1 = pneg %p1609_p0 }
  0x7a   : > { %595 = vrot.lane.b32.xlu0 %v1957_v24, %s1702_s29  ;;  %p1617_p6 = pnand %p1616_p5, %p1610_p1 }
  0x7b   : > { %509 = vrot.lane.b32.xlu1 %v1584_v55, %s1702_s29  ;;  %s2203_s29 = scalar_lea.hbm %s2261_s5, %s1358_s14 }
  0x90   : > { %v553_v5 = vpop.permute.xlu0 %552 }
  0x91   : > { %v551_v27 = vpop.permute.xlu1 %550 }
  0x94   : > { %v530_v29 = vpop.permute.xlu0 %529 }
  0x95   : > { %v496_v28 = vpop.permute.xlu1 %495  ;;  %v661_v34 = vsel %vm600_vm2, %v1889_v47, %v530_v29 }
  0x96   : > { %v684_v39 = vsel %vm617_vm3, %v661_v34, %v551_v27 }
  0x98   : > { %v532_v31 = vpop.permute.xlu0 %531 }
  0x99   : > { %v475_v30 = vpop.permute.xlu1 %474  ;;  %v664_v40 = vsel %vm600_vm2, %v1892_v48, %v532_v31 }
  0x9c   : > { %v434_v33 = vpop.permute.xlu0 %433 }
  0x9d   : > { %v477_v32 = vpop.permute.xlu1 %476  ;;  %v602_v37 = vsel %vm600_vm2, %v1859_v15, %v434_v33  ;;  %v686_v15 = vsel %vm617_vm3, %v664_v40, %v553_v5 }
  0x9e   : > { %v619_v38 = vsel %vm617_vm3, %v602_v37, %v475_v30 }
  0x9f   : > { %v636_v42 = vsel %vm634_vm4, %v619_v38, %v496_v28 }
  0xa0   : > { %v582_v24 = vpop.permute.xlu0 %581 }
  0xa1   : > { %v436_v60 = vpop.permute.xlu1 %435  ;;  %v700_v41 = vsel %vm634_vm4, %v684_v39, %v582_v24 }
  0xa2   : > { %930 = vmatprep.mubr.bf16.mxu0 %v700_v41  ;;  %v604_v45 = vsel %vm600_vm2, %v1850_v9, %v436_v60 }
  0xa3   : > { %931 = vmatmul.mubr.bf16.vlgmr.msra.gmra.mxu0 %v636_v42  ;;  %v621_v48 = vsel %vm617_vm3, %v604_v45, %v477_v32 }
  0xa4   : > { %v584_v43 = vpop.permute.xlu0 %583 }
  0xa5   : > { %v498_v47 = vpop.permute.xlu1 %497  ;;  %v703_v44 = vsel %vm634_vm4, %v686_v15, %v584_v43 }
  0xa6   : > { %938 = vmatprep.mubr.bf16.mxu0 %v703_v44  ;;  %v639_v50 = vsel %vm634_vm4, %v621_v48, %v498_v47 }
  0xa8   : > { %v534_v49 = vpop.permute.xlu0 %533 }
  0xa9   : > { %v438_v46 = vpop.permute.xlu1 %437  ;;  %v667_v57 = vsel %vm600_vm2, %v1910_v56, %v534_v49 }
  0xaa   : > { %v606_v55 = vsel %vm600_vm2, %v1845_v8, %v438_v46 }
  0xab   : > { %939 = vmatmul.mubr.bf16.gmra.mxu0 %v639_v50 }
  0xac   : > { %v555_v54 = vpop.permute.xlu0 %554 }
  0xad   : > { %v479_v53 = vpop.permute.xlu1 %478  ;;  %v688_v9 = vsel %vm617_vm3, %v667_v57, %v555_v54 }
  0xae   : > { %v623_v59 = vsel %vm617_vm3, %v606_v55, %v479_v53 }
  0xb0   : > { %v586_v62 = vpop.permute.xlu0 %585 }
  0xb1   : > { %v500_v61 = vpop.permute.xlu1 %499  ;;  %v706_v1 = vsel %vm634_vm4, %v688_v9, %v586_v62 }
  0xb2   : > { %v642_v63 = vsel %vm634_vm4, %v623_v59, %v500_v61  ;;  %946 = vmatprep.mubr.bf16.mxu0 %v706_v1 }
  0xb3   : > { %947 = vmatmul.mubr.bf16.gmra.mxu0 %v642_v63  ;;  %v1704_v63 = vmov 0.0  }
  0xb4   : > { %v536_v3 = vpop.permute.xlu0 %535  ;;  %1465 = vmatprep.subr.bf16.mxu1 %v1704_v63  ;;  %1481 = vmatprep.mubr.msk.bf16.mxu1 %vm1705_vm5, %v1704_v63 }
  0xb5   : > { %v440_v2 = vpop.permute.xlu1 %439  ;;  %v670_v56 = vsel %vm600_vm2, %v1954_v23, %v536_v3 }
  0xb6   : > { %v608_v8 = vsel %vm600_vm2, %v1842_v7, %v440_v2 }
  0xb8   : > { %v557_v6 = vpop.permute.xlu0 %556 }
  0xb9   : > { %v481_v4 = vpop.permute.xlu1 %480  ;;  %v690_v12 = vsel %vm617_vm3, %v670_v56, %v557_v6 }
  0xba   : > { %v625_v10 = vsel %vm617_vm3, %v608_v8, %v481_v4 }
  0xbc   : > { %v588_v14 = vpop.permute.xlu0 %587 }
  0xbd   : > { %v502_v11 = vpop.permute.xlu1 %501  ;;  %v709_v17 = vsel %vm634_vm4, %v690_v12, %v588_v14 }
  0xbe   : > { %v645_v16 = vsel %vm634_vm4, %v625_v10, %v502_v11  ;;  %954 = vmatprep.mubr.bf16.mxu0 %v709_v17 }
  0xbf   : > { %955 = vmatmul.mubr.bf16.gmra.mxu0 %v645_v16 }
  0xc0   : > { %v538_v19 = vpop.permute.xlu0 %537 }
  0xc1   : > { %v442_v18 = vpop.permute.xlu1 %441  ;;  %v673_v23 = vsel %vm600_vm2, %v1990_v36, %v538_v19 }
  0xc2   : > { %v610_v7 = vsel %vm600_vm2, %v1895_v51, %v442_v18 }
  0xc4   : > { %v559_v21 = vpop.permute.xlu0 %558 }
  0xc5   : > { %v483_v20 = vpop.permute.xlu1 %482  ;;  %v692_v5 = vsel %vm617_vm3, %v673_v23, %v559_v21 }
  0xc6   : > { %v627_v22 = vsel %vm617_vm3, %v610_v7, %v483_v20 }
  0xc8   : > { %v590_v27 = vpop.permute.xlu0 %589 }
  0xc9   : > { %v504_v25 = vpop.permute.xlu1 %503  ;;  %v712_v29 = vsel %vm634_vm4, %v692_v5, %v590_v27 }
  0xca   : > { %v648_v28 = vsel %vm634_vm4, %v627_v22, %v504_v25  ;;  %962 = vmatprep.mubr.bf16.mxu0 %v712_v29 }
  0xcb   : > { %963 = vmatmul.mubr.bf16.gmra.mxu0 %v648_v28 }
  0xcc   : > { %v540_v31 = vpop.permute.xlu0 %539 }
  0xcd   : > { %v444_v30 = vpop.permute.xlu1 %443  ;;  %v676_v36 = vsel %vm600_vm2, %v2020_v58, %v540_v31 }
  0xce   : > { %v612_v51 = vsel %vm600_vm2, %v1923_v0, %v444_v30 }
  0xd0   : > { %v561_v33 = vpop.permute.xlu0 %560 }
  0xd1   : > { %v485_v32 = vpop.permute.xlu1 %484  ;;  %v694_v60 = vsel %vm617_vm3, %v676_v36, %v561_v33 }
  0xd2   : > { %v629_v34 = vsel %vm617_vm3, %v612_v51, %v485_v32 }
  0xd4   : > { %v592_v38 = vpop.permute.xlu0 %591 }
  0xd5   : > { %v506_v37 = vpop.permute.xlu1 %505  ;;  %v715_v39 = vsel %vm634_vm4, %v694_v60, %v592_v38 }
  0xd6   : > { %v651_v24 = vsel %vm634_vm4, %v629_v34, %v506_v37  ;;  %970 = vmatprep.mubr.bf16.mxu0 %v715_v39 }
  0xd7   : > { %971 = vmatmul.mubr.bf16.gmra.mxu0 %v651_v24 }
  0xd8   : > { %v542_v41 = vpop.permute.xlu0 %541 }
  0xd9   : > { %v446_v40 = vpop.permute.xlu1 %445  ;;  %v679_v58 = vsel %vm600_vm2, %v2040_v13, %v542_v41 }
  0xda   : > { %v614_v0 = vsel %vm600_vm2, %v1984_v35, %v446_v40 }
  0xdc   : > { %v563_v47 = vpop.permute.xlu0 %562 }
  0xdd   : > { %v487_v42 = vpop.permute.xlu1 %486  ;;  %v696_v44 = vsel %vm617_vm3, %v679_v58, %v563_v47 }
  0xde   : > { %v631_v43 = vsel %vm617_vm3, %v614_v0, %v487_v42 }
  0xe0   : > { %v594_v45 = vpop.permute.xlu0 %593 }
  0xe1   : > { %v508_v15 = vpop.permute.xlu1 %507  ;;  %v718_v49 = vsel %vm634_vm4, %v696_v44, %v594_v45  ;;  %v1118_v45 = vld [vmem:[%s2260_s4] sm:$0xff] }
  0xe2   : > { %v654_v46 = vsel %vm634_vm4, %v631_v43, %v508_v15  ;;  %978 = vmatprep.mubr.bf16.mxu0 %v718_v49 }
  0xe3   : > { %979 = vmatmul.mubr.bf16.gmra.mxu0 %v654_v46  ;;  %v1119_v46 = vld [vmem:[%s2260_s4 + $0x8] sm:$0xff] }
  0xe4   : > { %v544_v50 = vpop.permute.xlu0 %543 }
  0xe5   : > { %v448_v48 = vpop.permute.xlu1 %447  ;;  %v682_v13 = vsel %vm600_vm2, %v2056_v26, %v544_v50  ;;  %v2139_v26 = vld [vmem:[%s2258_s2] ss:$0 sm:$0xff] }
  0xe6   : > { %v616_v35 = vsel %vm600_vm2, %v2008_v52, %v448_v48  ;;  %v1706_v48 = vmov 0  }
  0xe7   : > { %1566 = vset.pattern.permute.xlu0 %v1706_v48  ;;  %1567 = vset.pattern.permute.xlu1 %v1706_v48 }
  0xe8   : > { %v565_v54 = vpop.permute.xlu0 %564  ;;  %1122 = vperm.xlu0 %1566, %v1118_v45   ;;  %1127 = vperm.xlu1 %1567, %v1119_v46  }
  0xe9   : > { %v489_v53 = vpop.permute.xlu1 %488  ;;  %v698_v59 = vsel %vm617_vm3, %v682_v13, %v565_v54 }
  0xea   : > { %v633_v55 = vsel %vm617_vm3, %v616_v35, %v489_v53 }
  0xec   : > { %v596_v61 = vpop.permute.xlu0 %595 }
  0xed   : > { %v510_v57 = vpop.permute.xlu1 %509  ;;  %v721_v62 = vsel %vm634_vm4, %v698_v59, %v596_v61 }
  0xee   : > { %v657_v9 = vsel %vm634_vm4, %v633_v55, %v510_v57  ;;  %986 = vmatprep.mubr.bf16.mxu0 %v721_v62 }
  0xef   : > { %987 = vmatmul.mubr.bf16.gmra.mxu0 %v657_v9  ;;  %v1451_v1 = vpop.f32.mrf.mxu1 }
  0xf1   : > { %v1029_v2 = vpop.f32.mrf.mxu1 }
  0xf3   : > { %v1452_v8 = vpop.f32.mrf.mxu1 }
  0xf5   : > { %v1032_v14 = vpop.f32.mrf.mxu1 }
  0xf7   : > { %v1455_v7 = vpop.f32.mrf.mxu1 }
  0xf9   : > { %v1045_v30 = vpop.f32.mrf.mxu1 }
  0xfb   : > { %v1456_v37 = vpop.f32.mrf.mxu1 }
  0xfd   : > { %v1048_v42 = vpop.f32.mrf.mxu1 }
 0x163   : > { %v1378_v52 = vpop.f32.mrf.mxu0 }
 0x165   : > { %v1379_v3 = vpop.f32.mrf.mxu0 }
 0x166   : > { %v1380_v4 = vadd.f32 %v1379_v3, %v1378_v52 }
 0x167   : > { %v1381_v6 = vpop.f32.mrf.mxu0 }
 0x168   : > { %v933_v56 = vadd.f32 %v1380_v4, %v2139_v26 }
 0x169   : > { %v1382_v10 = vpop.f32.mrf.mxu0 }
 0x16a   : > { %v1383_v11 = vadd.f32 %v1382_v10, %v1381_v6  ;;  %v1030_v16 = vadd.f32 %v1029_v2, %v933_v56  ;;  %v1459_v10 = vpop.f32.mrf.mxu1 }
 0x16b   : > { %v1384_v12 = vpop.f32.mrf.mxu0 }
 0x16c   : > { %v936_v17 = vadd.f32 %v1383_v11, %v2139_v26  ;;  %v1092_v23 = vmax.f32 %v1030_v16, 0.0 }
 0x16d   : > { %v1385_v18 = vpop.f32.mrf.mxu0 }
 0x16e   : > { %v1386_v19 = vadd.f32 %v1385_v18, %v1384_v12  ;;  %v1033_v20 = vadd.f32 %v1032_v14, %v936_v17  ;;  %v1061_v12 = vpop.f32.mrf.mxu1 }
 0x16f   : > { %v1387_v21 = vpop.f32.mrf.mxu0 }
 0x170   : > { %v941_v22 = vadd.f32 %v1386_v19, %v2139_v26  ;;  %v1093_v25 = vmax.f32 %v1033_v20, 0.0  ;;  %v1460_v17 = vpop.f32.mrf.mxu1 }
 0x171   : > { %v1388_v5 = vpop.f32.mrf.mxu0 }
 0x172   : > { %v2144_v27 = vpack.c.bf16 %v1093_v25, %v1092_v23  ;;  %v1389_v28 = vadd.f32 %v1388_v5, %v1387_v21  ;;  %v1038_v31 = vadd.f32 %v1451_v1, %v941_v22  ;;  %v1064_v19 = vpop.f32.mrf.mxu1 }
 0x173   : > { %v1390_v29 = vpop.f32.mrf.mxu0 }
 0x174   : > { %v944_v32 = vadd.f32 %v1389_v28, %v2139_v26  ;;  %v1094_v60 = vmax.f32 %v1038_v31, 0.0  ;;  %v1463_v20 = vpop.f32.mrf.mxu1 }
 0x175   : > { %v1391_v33 = vpop.f32.mrf.mxu0 }
 0x176   : > { %v1041_v51 = vadd.f32 %v1452_v8, %v944_v32  ;;  %v1392_v36 = vadd.f32 %v1391_v33, %v1390_v29  ;;  %v1077_v23 = vpop.f32.mrf.mxu1 }
 0x177   : > { %v1393_v34 = vpop.f32.mrf.mxu0 }
 0x178   : > { %v1095_v38 = vmax.f32 %v1041_v51, 0.0  ;;  %v949_v24 = vadd.f32 %v1392_v36, %v2139_v26 }
 0x179   : > { %v1394_v39 = vpop.f32.mrf.mxu0 }
 0x17a   : > { %v1395_v40 = vadd.f32 %v1394_v39, %v1393_v34  ;;  %v2148_v41 = vpack.c.bf16 %v1095_v38, %v1094_v60  ;;  %v1046_v47 = vadd.f32 %v1045_v30, %v949_v24  ;;  %v1464_v30 = vpop.f32.mrf.mxu1 }
 0x17c   : > { %v952_v0 = vadd.f32 %v1395_v40, %v2139_v26  ;;  %v1096_v15 = vmax.f32 %v1046_v47, 0.0 }
 0x17e   : > { %v1049_v58 = vadd.f32 %v1048_v42, %v952_v0 }
 0x17f   : > { %v1396_v43 = vpop.f32.mrf.mxu0 }
 0x180   : > { %v1097_v44 = vmax.f32 %v1049_v58, 0.0 }
 0x181   : > { %v1397_v49 = vpop.f32.mrf.mxu0 }
 0x182   : > { %v2158_v50 = vpack.c.bf16 %v1097_v44, %v1096_v15  ;;  %v1398_v53 = vadd.f32 %v1397_v49, %v1396_v43 }
 0x183   : > { %v1399_v54 = vpop.f32.mrf.mxu0 }
 0x184   : > { %v957_v35 = vadd.f32 %v1398_v53, %v2139_v26 }
 0x185   : > { %v1400_v13 = vpop.f32.mrf.mxu0 }
 0x186   : > { %v1401_v55 = vadd.f32 %v1400_v13, %v1399_v54  ;;  %v1054_v57 = vadd.f32 %v1455_v7, %v957_v35 }
 0x188   : > { %v960_v59 = vadd.f32 %v1401_v55, %v2139_v26  ;;  %v1098_v62 = vmax.f32 %v1054_v57, 0.0 }
 0x18a   : > { %v1057_v61 = vadd.f32 %v1456_v37, %v960_v59  ;;  %v1080_v37 = vpop.f32.mrf.mxu1 }
 0x18b   : > { %v1402_v9 = vpop.f32.mrf.mxu0 }
 0x18c   : > { %v1099_v1 = vmax.f32 %v1057_v61, 0.0 }
 0x18d   : > { %v1403_v52 = vpop.f32.mrf.mxu0 }
 0x18e   : > { %v2162_v2 = vpack.c.bf16 %v1099_v1, %v1098_v62  ;;  %v1404_v54 = vadd.f32 %v1403_v52, %v1402_v9 }
 0x18f   : > { %v1405_v3 = vpop.f32.mrf.mxu0 }
 0x190   : > { %v965_v59 = vadd.f32 %v1404_v54, %v2139_v26 }
 0x191   : > { %v1406_v4 = vpop.f32.mrf.mxu0 }
 0x192   : > { %v1407_v49 = vadd.f32 %v1406_v4, %v1405_v3 }
 0x194   : > { %v968_v13 = vadd.f32 %v1407_v49, %v2139_v26 }
 0x196   : > { %v1065_v62 = vadd.f32 %v1064_v19, %v968_v13 }
 0x197   : > { %v1408_v6 = vpop.f32.mrf.mxu0 }
 0x199   : > { %v1409_v8 = vpop.f32.mrf.mxu0 }
 0x19a   : > { %v1410_v47 = vadd.f32 %v1409_v8, %v1408_v6  ;;  %v1062_v6 = vadd.f32 %v1061_v12, %v965_v59  ;;  %v1101_v8 = vmax.f32 %v1065_v62, 0.0 }
 0x19b   : > { %v1411_v56 = vpop.f32.mrf.mxu0 }
 0x19c   : > { %v973_v45 = vadd.f32 %v1410_v47, %v2139_v26  ;;  %v1100_v9 = vmax.f32 %v1062_v6, 0.0 }
 0x19d   : > { %v1412_v11 = vpop.f32.mrf.mxu0 }
 0x19e   : > { %v1413_v24 = vadd.f32 %v1412_v11, %v1411_v56  ;;  %v1070_v35 = vadd.f32 %v1459_v10, %v973_v45  ;;  %v1114_v52 = vpack.c.bf16 %v1101_v8, %v1100_v9  ;;  %v1145_v56 = vsel %vm600_vm2, %v2158_v50, 0  ;;  %v1123_v50 = vpop.permute.xlu0 %1122 }
 0x19f   : > { %v1142_v10 = vsel %vm600_vm2, %v2148_v41, 0  ;;  %v1139_v11 = vsel %vm600_vm2, %v2144_v27, 0  ;;  %v1128_v27 = vpop.permute.xlu1 %1127 }
 0x1a0   : > { %v976_v43 = vadd.f32 %v1413_v24, %v2139_v26  ;;  %v1102_v61 = vmax.f32 %v1070_v35, 0.0  ;;  %v1151_v4 = vsel %vm600_vm2, %v1114_v52, 0 }
 0x1a2   : > { %v1073_v48 = vadd.f32 %v1460_v17, %v976_v43 }
 0x1a3   : > { %v1414_v14 = vpop.f32.mrf.mxu0 }
 0x1a4   : > { %v1103_v55 = vmax.f32 %v1073_v48, 0.0 }
 0x1a5   : > { %v1415_v16 = vpop.f32.mrf.mxu0 }
 0x1a6   : > { %v1416_v32 = vadd.f32 %v1415_v16, %v1414_v14  ;;  %v1115_v1 = vpack.c.bf16 %v1103_v55, %v1102_v61 }
 0x1a7   : > { %v1417_v18 = vpop.f32.mrf.mxu0 }
 0x1a8   : > { %v981_v60 = vadd.f32 %v1416_v32, %v2139_v26  ;;  %v1154_v3 = vsel %vm600_vm2, %v1115_v1, 0 }
 0x1a9   : > { %v1418_v21 = vpop.f32.mrf.mxu0 }
 0x1aa   : > { %v1419_v28 = vadd.f32 %v1418_v21, %v1417_v18  ;;  %v1078_v0 = vadd.f32 %v1077_v23, %v981_v60 }
 0x1ac   : > { %v984_v51 = vadd.f32 %v1419_v28, %v2139_v26  ;;  %v1104_v46 = vmax.f32 %v1078_v0, 0.0 }
 0x1ae   : > { %v1081_v39 = vadd.f32 %v1080_v37, %v984_v51 }
 0x1af   : > { %v1420_v7 = vpop.f32.mrf.mxu0 }
 0x1b0   : > { %v1105_v15 = vmax.f32 %v1081_v39, 0.0 }
 0x1b1   : > { %v1421_v22 = vpop.f32.mrf.mxu0 }
 0x1b2   : > { %v1422_v25 = vadd.f32 %v1421_v22, %v1420_v7  ;;  %v1116_v53 = vpack.c.bf16 %v1105_v15, %v1104_v46 }
 0x1b3   : > { %v1423_v5 = vpop.f32.mrf.mxu0 }
 0x1b4   : > { %v989_v29 = vadd.f32 %v1422_v25, %v2139_v26  ;;  %v1157_v57 = vsel %vm600_vm2, %v1116_v53, 0 }
 0x1b5   : > { %v1424_v31 = vpop.f32.mrf.mxu0 }
 0x1b6   : > { %v1425_v33 = vadd.f32 %v1424_v31, %v1423_v5  ;;  %v1086_v36 = vadd.f32 %v1463_v20, %v989_v29 }
 0x1b8   : > { %v992_v34 = vadd.f32 %v1425_v33, %v2139_v26  ;;  %v1106_v40 = vmax.f32 %v1086_v36, 0.0  ;;  %v1148_v26 = vsel %vm600_vm2, %v2162_v2, 0  ;;  %v1606_v2 = vld [vmem:[%s2259_s3] sm:$0xff]  }
 0x1ba   : > { %v1089_v38 = vadd.f32 %v1464_v30, %v992_v34 }
 0x1bc   : > { %v1107_v42 = vmax.f32 %v1089_v38, 0.0 }
 0x1be   : > { %v1117_v58 = vpack.c.bf16 %v1107_v42, %v1106_v40 }
 0x1c0   : > { %v1160_v44 = vsel %vm600_vm2, %v1117_v58, 0 }
 0x1c1   : > { %1466 = vmatpush3.bf16.xpose.msra.mxu1 %v1160_v44 }
 0x1c2   : > { %1467 = vmatprep.subr.bf16.mxu1 %v1704_v63 }
 0x1c9   : > { %1468 = vmatpush3.bf16.xpose.msra.mxu1 %v1157_v57 }
 0x1ca   : > { %1469 = vmatprep.subr.bf16.mxu1 %v1704_v63 }
 0x1d1   : > { %1470 = vmatpush3.bf16.xpose.msra.mxu1 %v1154_v3 }
 0x1d2   : > { %1471 = vmatprep.subr.bf16.mxu1 %v1704_v63 }
 0x1d9   : > { %1472 = vmatpush3.bf16.xpose.msra.mxu1 %v1151_v4 }
 0x1da   : > { %1473 = vmatprep.subr.bf16.mxu1 %v1704_v63 }
 0x1e1   : > { %1474 = vmatpush3.bf16.xpose.msra.mxu1 %v1148_v26 }
 0x1e2   : > { %1475 = vmatprep.subr.bf16.mxu1 %v1704_v63 }
 0x1e9   : > { %1476 = vmatpush3.bf16.xpose.msra.mxu1 %v1145_v56 }
 0x1ea   : > { %1477 = vmatprep.subr.bf16.mxu1 %v1704_v63 }
 0x1f1   : > { %1478 = vmatpush3.bf16.xpose.msra.mxu1 %v1142_v10 }
 0x1f2   : > { %1479 = vmatprep.subr.bf16.mxu1 %v1704_v63 }
 0x1f9   : > { %1480 = vmatpush3.bf16.xpose.msra.mxu1 %v1139_v11 }
 0x200   : > { %1482 = vmatmul.mubr.msk.bf16.vlgmr.msra.gmra.mxu1 %vm600_vm2, %v1606_v2 }
 0x2c0   : > { %v1196_v12 = vpop.f32.mrf.mxu1 }
 0x2c1   : > { %v1197_v63 = vadd.f32 %v1196_v12, %v1123_v50 }
 0x2c2   : > { %v1483_v41 = vpop.f32.mrf.mxu1 }
 0x2c3   : > { %1203 = vst [vmem:[%s231_s30] sm:$0xff] %v1197_v63 }
 0x2c4   : > { %v1199_v14 = vpop.f32.mrf.mxu1 }
 0x2c5   : > { %v1200_v16 = vadd.f32 %v1199_v14, %v1128_v27 }
 0x2c6   : > { %v1484_v17 = vpop.f32.mrf.mxu1 }
 0x2c7   : > { %1204 = vst [vmem:[%s231_s30 + $0x8] sm:$0xff] %v1200_v16 }
 0x2c8   : > { %1620 = shalt.err (!%p1617_p6)
}
 0x2c9   : > { %s1621_s13 = scalar_lea.hbm %s2203_s29, 256  ;;  %s1625_s26 = scalar_lea.hbm %s2261_s5, 1024 }
 0x2ca   : > { %p1622_p7 = scmp.ne.s32.totalorder %s2203_s29, %s1621_s13  ;;  %p1626_p11 = scmp.lt.s32.totalorder %s2203_s29, %s2261_s5 }
 0x2cb   : > { %p1627_p12 = scmp.lt.s32.totalorder %s1625_s26, %s1621_s13 }
 0x2cc   : > { %p1623_p9 = pnand %p1622_p7, %p1792_p3 }
 0x2cd   : > { %p1628_p13 = por %p1627_p12, %p1626_p11 }
 0x2ce   : > { %p1624_p10 = pneg %p1623_p9 }
 0x2d0   : > { %p1629_p0 = pnand %p1628_p13, %p1624_p10 }
 0x2d2   : > { %1632 = shalt.err (!%p1629_p0)
}
 0x2d3   : > { %s1708_s14 = smov 128   ;;  %s1709_s28 = smov 256  }
 0x2d4   : > { %s1710_s22 = smov 8  }
 0x2d5   : > { %1486 = dma.vmem_to_hbm [thread:$0]  (%p1792_p3), %s2198_s8, 256, %s2203_s29, %s2205_s21, %s1708_s14, %s1709_s28, %s1710_s22  }
 0x2d6 PF: > { %p1492_p1 = scmp.ge.s32.totalorder %s1699_s25, 2  ;;  %s1235_s17 = sand.u32 1, %s1671_s18  }
 0x2d7   : > { %s1236_s9 = scalar_lea.sflag [#allocation3], %s1235_s17 }
 0x2d8   : > { %p1489_p2 = pnand %p1492_p1, %p1801_p8 }
 0x2da   : > { %p1490_p4 = pneg %p1489_p2 }
 0x2dc   : > { %1666 = dma.done.wait (%p1490_p4), %s1236_s9, 256  }
 0x2dd   : > { %1668 = vsyncadd (%p1490_p4), %s1236_s9, 4294967040  ;;  %s18_s25 = sadd.s32 1, %s1699_s25   ;;  %s2268_s6 = sld [smem:[#allocation5_spill]] }
 0x2de   : > { %p15_p5 = scmp.ge.s32.totalorder %s18_s25, 6   ;;  %s2269_s8 = sld [smem:[#allocation6_spill]] }
 0x2df   : > { %s2270_s18 = smov %s1675_s19  ;;  %s2271_s19 = smov %s1679_s20 }
 0x2e0   : > { %s2272_s20 = smov %s1810_s11  ;;  %s2273_s21 = smov %s1691_s23 }
 0x2e1   : > { %s2274_s22 = smov %s1695_s24  ;;  %17 = sbr.rel (!%p15_p5) target bundleno = 5 (0x5), region = 76 }
 0x2e3   : > { %s2275_s23 = smov %s2268_s6 }
 0x2e4   : > { %s2276_s24 = smov %s2269_s8 }
 0x2e6   :  { %1241 = vsyncpa [#allocation3], 1 }
 0x2e7   :  { %1243 = vsyncpa [#allocation3 + $0x1], 1 }

</bundles_post_ra>
